<compile_context>
chip_gen: v7x
topology: tpu7x:2x2x1
jax: 0.10.0
libtpu: 0.0.40
codegen_flags: <defaults>
</compile_context>

<pallas_src>
import functools

import jax
import jax.numpy as jnp
from jax.experimental import pallas as pl
from jax.experimental.pallas import tpu as pltpu

_EPS = 1e-5  # PyTorch BatchNorm2d default


# ---------------------------------------------------------------------------
# Wrapper-side packing helpers (weight-sized, computed once per module).
# ---------------------------------------------------------------------------
def _pack_conv3x3(w, W):
    """(3, 3, Cin, Cout) HWIO conv weights -> (3*W*Cin, W*Cout) banded slab.

    Row-block k (k = 0, 1, 2 <-> input row r-1, r, r+1) is the banded matrix
    band_k[a*Cin+i, b*Cout+o] = w[k, (a-b)+1, i, o] if |a-b| <= 1 else 0, so one matmul
    of the lane-dense [x_up | x | x_dn] slab applies all nine taps of the 3x3 conv,
    including the W-edge zero padding.
    """
    kh, kw, Cin, Cout = w.shape
    a = jnp.arange(W)
    d = jnp.arange(kw)
    sel = (a[:, None, None] - a[None, :, None]) == (d[None, None, :] - (kw // 2))
    packed = jnp.einsum("kdio,abd->kaibo", w, sel.astype(w.dtype))
    return packed.reshape(kh * W * Cin, W * Cout)


def _pack_conv1x1(w, W):
    """(Cin, Cout) 1x1 conv weights -> block-diagonal (W*Cin, W*Cout)."""
    Cin, Cout = w.shape
    eye = jnp.eye(W, dtype=w.dtype)
    return jnp.einsum("io,ab->aibo", w, eye).reshape(W * Cin, W * Cout)


def _channel_group_matrix(W, C):
    """(W*C, W*C) 0/1 matrix P with P[l, l'] = 1 iff lanes l, l' hold the same channel."""
    lane_c = jnp.arange(W * C) % C
    return (lane_c[:, None] == lane_c[None, :]).astype(jnp.float32)


def pack_residual_block(params, N, H, W, dim_in, dim_out):
    """Pack weights/constants into kernel-ready slabs.  Cache across forward calls."""
    count = N * H * W

    def bn_row(v):
        return jnp.tile(v.reshape(1, dim_out).astype(jnp.float32), (1, W))

    packed = dict(
        # bf16 MXU operands (f32 accumulation in-kernel)
        w1=_pack_conv3x3(params["w1"].astype(jnp.float32), W).astype(jnp.bfloat16),
        w2=_pack_conv3x3(params["w2"].astype(jnp.float32), W).astype(jnp.bfloat16),
        # BN affine params tiled to the lane-dense layout (stats path stays f32)
        g1=bn_row(params["g1"]), b1=bn_row(params["b1"]),
        g2=bn_row(params["g2"]), b2=bn_row(params["b2"]),
        # channel-group reduce/broadcast matrix with 1/(N*H*W) folded in
        pmat=_channel_group_matrix(W, dim_out) * (1.0 / float(count)),
    )
    if dim_in != dim_out:
        packed["ws"] = _pack_conv1x1(params["ws"].astype(jnp.float32), W).astype(jnp.bfloat16)
        packed["gs"] = bn_row(params["gs"])
        packed["bs"] = bn_row(params["bs"])
    return packed


# ---------------------------------------------------------------------------
# Kernel
# ---------------------------------------------------------------------------
def _make_kernel(N, H, W, dim_in, dim_out, use_shortcut_conv):
    R = N * H

    def _conv3x3(x_f32, w_all):
        """3x3 'same' conv on a lane-dense (R, W*Cin) slab.

        +/-1 row shift = XLU sublane roll + per-image boundary mask (applied BEFORE the
        matmul so rows never leak across images); width taps and W-edge padding are
        folded into the banded bf16 weight slab.  One K=3*W*Cin matmul when the lane
        offsets are 128-aligned, else one matmul per row tap.
        """
        win = x_f32.shape[1]
        hh = jax.lax.broadcasted_iota(jnp.int32, (R, win), 0) % H
        x_up = jnp.where(hh > 0, pltpu.roll(x_f32, 1, axis=0), 0.0)          # row r <- r-1
        x_dn = jnp.where(hh < H - 1, pltpu.roll(x_f32, R - 1, axis=0), 0.0)  # row r <- r+1
        if win % 128 == 0:
            xk = jnp.concatenate([x_up, x_f32, x_dn], axis=1).astype(jnp.bfloat16)
            return jnp.dot(xk, w_all, preferred_element_type=jnp.float32)
        # Unaligned lane width (e.g. W*Cin = 64): per-tap matmuls instead of an
        # unaligned lane concatenation.
        acc = jnp.dot(x_up.astype(jnp.bfloat16), w_all[:win],
                      preferred_element_type=jnp.float32)
        acc = acc + jnp.dot(x_f32.astype(jnp.bfloat16), w_all[win:2 * win],
                            preferred_element_type=jnp.float32)
        acc = acc + jnp.dot(x_dn.astype(jnp.bfloat16), w_all[2 * win:],
                            preferred_element_type=jnp.float32)
        return acc

    def _bn(y, p, g, b):
        # Training-mode BatchNorm: f32 batch statistics over N*H*W, biased variance,
        # eps=1e-5, affine.  The per-channel reduce/broadcast is an MXU matmul with the
        # (W*C, W*C) 0/1 group matrix (1/count pre-folded), so the data never leaves
        # the lane-dense layout; scale/shift are precomputed on the (1, W*C) row so the
        # slab-wide work is y*scale + shift.
        s = jnp.sum(y, axis=0, keepdims=True)             # (1, W*C) f32
        sq = jnp.sum(y * y, axis=0, keepdims=True)        # (1, W*C) f32
        mean = jnp.dot(s, p, preferred_element_type=jnp.float32)
        var = jnp.dot(sq, p, preferred_element_type=jnp.float32) - mean * mean
        # TODO(synk): one-pass E[x^2]-E[x]^2 can cancel when |mean| >> std; use a
        # shifted/two-pass sum for production activation statistics.
        scale = jax.lax.rsqrt(var + _EPS) * g             # (1, W*C)
        shift = b - mean * scale
        return y * scale + shift

    def _main(x_f32, p, w1, g1, b1, w2, g2, b2):
        y1 = _bn(_conv3x3(x_f32, w1), p, g1, b1)
        y1 = jnp.maximum(y1, 0.0)                         # ReLU
        return _bn(_conv3x3(y1, w2), p, g2, b2)

    if use_shortcut_conv:
        def kernel(x_ref, p_ref, w1_ref, g1_ref, b1_ref, w2_ref, g2_ref, b2_ref,
                   ws_ref, gs_ref, bs_ref, out_ref):
            x = x_ref[...]
            p = p_ref[...]
            y2 = _main(x, p, w1_ref[...], g1_ref[...], b1_ref[...],
                       w2_ref[...], g2_ref[...], b2_ref[...])
            s = jnp.dot(x.astype(jnp.bfloat16), ws_ref[...],   # 1x1 shortcut conv
                        preferred_element_type=jnp.float32)
            out_ref[...] = _bn(s, p, gs_ref[...], bs_ref[...]) + y2
    else:
        def kernel(x_ref, p_ref, w1_ref, g1_ref, b1_ref, w2_ref, g2_ref, b2_ref,
                   out_ref):
            x = x_ref[...]
            p = p_ref[...]
            y2 = _main(x, p, w1_ref[...], g1_ref[...], b1_ref[...],
                       w2_ref[...], g2_ref[...], b2_ref[...])
            out_ref[...] = x + y2                         # identity shortcut (f32 x)

    return kernel


# ---------------------------------------------------------------------------
# Wrapper
# ---------------------------------------------------------------------------
@functools.partial(jax.jit, static_argnames=("dim_in", "dim_out"))
def residual_block(x_nchw, packed, *, dim_in, dim_out):
    """Fused Pallas forward.  x_nchw: (N, Cin, H, W); packed: pack_residual_block()."""
    N, C, H, W = x_nchw.shape
    assert C == dim_in
    use_shortcut_conv = dim_in != dim_out
    R, WCin, WCout = N * H, W * dim_in, W * dim_out

    # Layout glue: NCHW -> lane-dense (N*H, W*Cin) slab (lane index = w*Cin + ci).
    # TODO(synk): hoist this transpose outside the block when chaining ResidualBlocks.
    x2d = jnp.transpose(x_nchw, (0, 2, 3, 1)).astype(jnp.float32).reshape(R, WCin)

    args = [x2d, packed["pmat"], packed["w1"], packed["g1"], packed["b1"],
            packed["w2"], packed["g2"], packed["b2"]]
    if use_shortcut_conv:
        args += [packed["ws"], packed["gs"], packed["bs"]]

    kernel = _make_kernel(N, H, W, dim_in, dim_out, use_shortcut_conv)
    vmem = pl.BlockSpec(memory_space=pltpu.MemorySpace.VMEM)

    # Single-shot (gridless) kernel: everything fits comfortably in VMEM at these
    # shapes.  TODO(synk): grid over N*H row tiles ("parallel" -> both v7x TensorCores)
    # with two-phase BN statistics for production sizes.
    out2d = pl.pallas_call(
        kernel,
        out_shape=jax.ShapeDtypeStruct((R, WCout), jnp.float32),   # lane-dense output
        in_specs=[vmem] * len(args),
        out_specs=vmem,
        compiler_params=pltpu.CompilerParams(vmem_limit_bytes=32 * 1024 * 1024),
    )(*args)

    # Layout glue back: (N*H, W*Cout) -> NCHW.
    return jnp.transpose(out2d.reshape(N, H, W, dim_out), (0, 3, 1, 2))


# ---------------------------------------------------------------------------
# Parameters and pure-JAX reference
# ---------------------------------------------------------------------------
def init_params(key, dim_in, dim_out):
    """Deterministic synthetic parameters (shapes follow the nn.Module __init__)."""
    ks = jax.random.split(key, 9)
    s = 0.1
    return dict(
        # conv weights stored HWIO (kH, kW, Cin, Cout)
        w1=s * jax.random.normal(ks[0], (3, 3, dim_in, dim_out), jnp.float32),
        g1=1.0 + 0.1 * jax.random.normal(ks[1], (1, dim_out), jnp.float32),
        b1=0.1 * jax.random.normal(ks[2], (1, dim_out), jnp.float32),
        w2=s * jax.random.normal(ks[3], (3, 3, dim_out, dim_out), jnp.float32),
        g2=1.0 + 0.1 * jax.random.normal(ks[4], (1, dim_out), jnp.float32),
        b2=0.1 * jax.random.normal(ks[5], (1, dim_out), jnp.float32),
        # 1x1 shortcut conv stored as (Cin, Cout); unused when dim_in == dim_out
        ws=s * jax.random.normal(ks[6], (dim_in, dim_out), jnp.float32),
        gs=1.0 + 0.1 * jax.random.normal(ks[7], (1, dim_out), jnp.float32),
        bs=0.1 * jax.random.normal(ks[8], (1, dim_out), jnp.float32),
    )


def _ref_forward(x_nchw, p, dim_in, dim_out):
    """Pure-JAX f32 reference (mirrors the PyTorch training-mode forward)."""
    x = jnp.transpose(x_nchw, (0, 2, 3, 1)).astype(jnp.float32)

    def conv3(x, w):
        return jax.lax.conv_general_dilated(
            x, w, (1, 1), "SAME",
            dimension_numbers=("NHWC", "HWIO", "NHWC"),
            precision=jax.lax.Precision.HIGHEST)

    def bn(y, g, b):
        mean = jnp.mean(y, axis=(0, 1, 2), keepdims=True)
        var = jnp.mean((y - mean) ** 2, axis=(0, 1, 2), keepdims=True)
        return ((y - mean) * jax.lax.rsqrt(var + _EPS)
                * g.reshape(1, 1, 1, -1) + b.reshape(1, 1, 1, -1))

    y = conv3(x, p["w1"])
    y = jnp.maximum(bn(y, p["g1"], p["b1"]), 0.0)
    y = conv3(y, p["w2"])
    y = bn(y, p["g2"], p["b2"])
    if dim_in != dim_out:
        s = jnp.einsum("nhwi,io->nhwo", x, p["ws"],
                       precision=jax.lax.Precision.HIGHEST)
        s = bn(s, p["gs"], p["bs"])
    else:
        s = x
    return jnp.transpose(s + y, (0, 3, 1, 2))


if __name__ == "__main__":
    key = jax.random.PRNGKey(0)
    kx, kp = jax.random.split(key)
    # Tolerance reflects bf16 MXU operands vs. the f32 reference (BN stats stay f32).
    TOL = dict(atol=2e-2, rtol=2e-2)

    # Case 1: dim_in != dim_out  (1x1 conv + BN shortcut; W*Cin=64 -> per-tap conv path)
    dim_in, dim_out = 4, 8
    x = jax.random.normal(kx, (2, dim_in, 16, 16), jnp.float32)
    params = init_params(kp, dim_in, dim_out)
    packed = pack_residual_block(params, 2, 16, 16, dim_in, dim_out)
    out = jax.block_until_ready(
        residual_block(x, packed, dim_in=dim_in, dim_out=dim_out))
    ref = _ref_forward(x, params, dim_in, dim_out)
    assert out.shape == (2, dim_out, 16, 16)
    assert jnp.allclose(out, ref, **TOL), float(jnp.max(jnp.abs(out - ref)))

    # Case 2: dim_in == dim_out  (identity shortcut; W*C=128 -> fused K=384 conv path)
    dim_in2 = dim_out2 = 8
    x2 = jax.random.normal(kx, (2, dim_in2, 16, 16), jnp.float32)
    params2 = init_params(kp, dim_in2, dim_out2)
    packed2 = pack_residual_block(params2, 2, 16, 16, dim_in2, dim_out2)
    out2 = jax.block_until_ready(
        residual_block(x2, packed2, dim_in=dim_in2, dim_out=dim_out2))
    ref2 = _ref_forward(x2, params2, dim_in2, dim_out2)
    assert jnp.allclose(out2, ref2, **TOL), float(jnp.max(jnp.abs(out2 - ref2)))

    print("KERNEL_OK")
</pallas_src>

<mosaic_0001>
module attributes {stable_mosaic.version = 11 : i64} {
  func.func @kernel(%arg0: memref<32x64xf32, #tpu.memory_space<vmem>>, %arg1: memref<128x128xf32, #tpu.memory_space<vmem>>, %arg2: memref<192x128xbf16, #tpu.memory_space<vmem>>, %arg3: memref<1x128xf32, #tpu.memory_space<vmem>>, %arg4: memref<1x128xf32, #tpu.memory_space<vmem>>, %arg5: memref<384x128xbf16, #tpu.memory_space<vmem>>, %arg6: memref<1x128xf32, #tpu.memory_space<vmem>>, %arg7: memref<1x128xf32, #tpu.memory_space<vmem>>, %arg8: memref<64x128xbf16, #tpu.memory_space<vmem>>, %arg9: memref<1x128xf32, #tpu.memory_space<vmem>>, %arg10: memref<1x128xf32, #tpu.memory_space<vmem>>, %arg11: memref<32x128xf32, #tpu.memory_space<vmem>>) attributes {dimension_semantics = [], scalar_prefetch = 0 : i64, scratch_operands = 0 : i64, tpu.core_type = #tpu.core_type<tc>} {
    %c0 = arith.constant 0 : index
    %c0_0 = arith.constant 0 : index
    %0 = vector.load %arg0[%c0, %c0_0] : memref<32x64xf32, #tpu.memory_space<vmem>>, vector<32x64xf32>
    %c0_1 = arith.constant 0 : index
    %c0_2 = arith.constant 0 : index
    %1 = vector.load %arg1[%c0_1, %c0_2] : memref<128x128xf32, #tpu.memory_space<vmem>>, vector<128x128xf32>
    %c0_3 = arith.constant 0 : index
    %c0_4 = arith.constant 0 : index
    %2 = vector.load %arg2[%c0_3, %c0_4] : memref<192x128xbf16, #tpu.memory_space<vmem>>, vector<192x128xbf16>
    %c0_5 = arith.constant 0 : index
    %c0_6 = arith.constant 0 : index
    %3 = vector.load %arg3[%c0_5, %c0_6] : memref<1x128xf32, #tpu.memory_space<vmem>>, vector<1x128xf32>
    %c0_7 = arith.constant 0 : index
    %c0_8 = arith.constant 0 : index
    %4 = vector.load %arg4[%c0_7, %c0_8] : memref<1x128xf32, #tpu.memory_space<vmem>>, vector<1x128xf32>
    %c0_9 = arith.constant 0 : index
    %c0_10 = arith.constant 0 : index
    %5 = vector.load %arg5[%c0_9, %c0_10] : memref<384x128xbf16, #tpu.memory_space<vmem>>, vector<384x128xbf16>
    %c0_11 = arith.constant 0 : index
    %c0_12 = arith.constant 0 : index
    %6 = vector.load %arg6[%c0_11, %c0_12] : memref<1x128xf32, #tpu.memory_space<vmem>>, vector<1x128xf32>
    %c0_13 = arith.constant 0 : index
    %c0_14 = arith.constant 0 : index
    %7 = vector.load %arg7[%c0_13, %c0_14] : memref<1x128xf32, #tpu.memory_space<vmem>>, vector<1x128xf32>
    %8 = tpu.iota {dimensions = array<i32: 0>} : vector<32x64xi32>
    %c16_i32 = arith.constant 16 : i32
    %c0_i32 = arith.constant 0 : i32
    %9 = arith.cmpi eq, %c16_i32, %c0_i32 : i32
    %c1_i32 = arith.constant 1 : i32
    %10 = arith.select %9, %c1_i32, %c16_i32 : i32
    %11 = vector.broadcast %10 : i32 to vector<32x64xi32>
    %12 = arith.remsi %8, %11 : vector<32x64xi32>
    %c0_i32_15 = arith.constant 0 : i32
    %13 = vector.broadcast %c0_i32_15 : i32 to vector<32x64xi32>
    %14 = arith.cmpi ne, %12, %13 : vector<32x64xi32>
    %c0_i32_16 = arith.constant 0 : i32
    %15 = vector.broadcast %c0_i32_16 : i32 to vector<32x64xi32>
    %16 = arith.cmpi slt, %12, %15 : vector<32x64xi32>
    %c0_i32_17 = arith.constant 0 : i32
    %17 = arith.cmpi slt, %10, %c0_i32_17 : i32
    %18 = vector.broadcast %17 : i1 to vector<32x64xi1>
    %19 = vector.broadcast %18 : vector<32x64xi1> to vector<32x64xi1>
    %20 = arith.xori %16, %19 : vector<32x64xi1>
    %21 = arith.andi %20, %14 : vector<32x64xi1>
    %22 = vector.broadcast %10 : i32 to vector<32x64xi32>
    %23 = arith.addi %12, %22 : vector<32x64xi32>
    %24 = arith.select %21, %23, %12 : vector<32x64xi1>, vector<32x64xi32>
    %c0_i32_18 = arith.constant 0 : i32
    %25 = vector.broadcast %c0_i32_18 : i32 to vector<32x64xi32>
    %26 = arith.cmpi sgt, %24, %25 : vector<32x64xi32>
    %c1_i32_19 = arith.constant 1 : i32
    %27 = tpu.dynamic_rotate %0 by %c1_i32_19 dim 0 : vector<32x64xf32>, i32 -> vector<32x64xf32>
    %cst = arith.constant 0.000000e+00 : f32
    %28 = vector.broadcast %cst : f32 to vector<32x64xf32>
    %29 = arith.select %26, %27, %28 : vector<32x64xi1>, vector<32x64xf32>
    %c15_i32 = arith.constant 15 : i32
    %30 = vector.broadcast %c15_i32 : i32 to vector<32x64xi32>
    %31 = arith.cmpi slt, %24, %30 : vector<32x64xi32>
    %c31_i32 = arith.constant 31 : i32
    %32 = tpu.dynamic_rotate %0 by %c31_i32 dim 0 : vector<32x64xf32>, i32 -> vector<32x64xf32>
    %cst_20 = arith.constant 0.000000e+00 : f32
    %33 = vector.broadcast %cst_20 : f32 to vector<32x64xf32>
    %34 = arith.select %31, %32, %33 : vector<32x64xi1>, vector<32x64xf32>
    %35 = arith.truncf %29 : vector<32x64xf32> to vector<32x64xbf16>
    %36 = vector.extract_strided_slice %2 {offsets = [0, 0], sizes = [64, 128], strides = [1, 1]} : vector<192x128xbf16> to vector<64x128xbf16>
    %cst_21 = arith.constant dense<0.000000e+00> : vector<32x128xf32>
    %37 = tpu.matmul %35, %36, %cst_21 {dimension_numbers = #tpu.dot_dimension_numbers<[1], [0], [0], [1], [0, 0, 1, 1], [], []>} : vector<32x64xbf16>, vector<64x128xbf16>, vector<32x128xf32> -> vector<32x128xf32>
    %38 = arith.truncf %0 : vector<32x64xf32> to vector<32x64xbf16>
    %39 = vector.extract_strided_slice %2 {offsets = [64, 0], sizes = [64, 128], strides = [1, 1]} : vector<192x128xbf16> to vector<64x128xbf16>
    %cst_22 = arith.constant dense<0.000000e+00> : vector<32x128xf32>
    %40 = tpu.matmul %38, %39, %cst_22 {dimension_numbers = #tpu.dot_dimension_numbers<[1], [0], [0], [1], [0, 0, 1, 1], [], []>} : vector<32x64xbf16>, vector<64x128xbf16>, vector<32x128xf32> -> vector<32x128xf32>
    %41 = arith.addf %37, %40 : vector<32x128xf32>
    %42 = arith.truncf %34 : vector<32x64xf32> to vector<32x64xbf16>
    %43 = vector.extract_strided_slice %2 {offsets = [128, 0], sizes = [64, 128], strides = [1, 1]} : vector<192x128xbf16> to vector<64x128xbf16>
    %cst_23 = arith.constant dense<0.000000e+00> : vector<32x128xf32>
    %44 = tpu.matmul %42, %43, %cst_23 {dimension_numbers = #tpu.dot_dimension_numbers<[1], [0], [0], [1], [0, 0, 1, 1], [], []>} : vector<32x64xbf16>, vector<64x128xbf16>, vector<32x128xf32> -> vector<32x128xf32>
    %45 = arith.addf %41, %44 : vector<32x128xf32>
    %cst_24 = arith.constant dense<0.000000e+00> : vector<128xf32>
    %46 = vector.multi_reduction <add>, %45, %cst_24 [0] : vector<32x128xf32> to vector<128xf32>
    %47 = vector.shape_cast %46 : vector<128xf32> to vector<1x128xf32>
    %48 = arith.mulf %45, %45 : vector<32x128xf32>
    %cst_25 = arith.constant dense<0.000000e+00> : vector<128xf32>
    %49 = vector.multi_reduction <add>, %48, %cst_25 [0] : vector<32x128xf32> to vector<128xf32>
    %50 = vector.shape_cast %49 : vector<128xf32> to vector<1x128xf32>
    %cst_26 = arith.constant dense<0.000000e+00> : vector<1x128xf32>
    %51 = tpu.matmul %47, %1, %cst_26 {dimension_numbers = #tpu.dot_dimension_numbers<[1], [0], [0], [1], [0, 0, 1, 1], [], []>} : vector<1x128xf32>, vector<128x128xf32>, vector<1x128xf32> -> vector<1x128xf32>
    %cst_27 = arith.constant dense<0.000000e+00> : vector<1x128xf32>
    %52 = tpu.matmul %50, %1, %cst_27 {dimension_numbers = #tpu.dot_dimension_numbers<[1], [0], [0], [1], [0, 0, 1, 1], [], []>} : vector<1x128xf32>, vector<128x128xf32>, vector<1x128xf32> -> vector<1x128xf32>
    %53 = arith.mulf %51, %51 : vector<1x128xf32>
    %54 = arith.subf %52, %53 : vector<1x128xf32>
    %cst_28 = arith.constant 9.99999974E-6 : f32
    %55 = vector.broadcast %cst_28 : f32 to vector<1x128xf32>
    %56 = arith.addf %54, %55 : vector<1x128xf32>
    %57 = math.rsqrt %56 : vector<1x128xf32>
    %58 = arith.mulf %57, %3 : vector<1x128xf32>
    %59 = arith.mulf %51, %58 : vector<1x128xf32>
    %60 = arith.subf %4, %59 : vector<1x128xf32>
    %61 = vector.broadcast %58 : vector<1x128xf32> to vector<32x128xf32>
    %62 = arith.mulf %45, %61 : vector<32x128xf32>
    %63 = vector.broadcast %60 : vector<1x128xf32> to vector<32x128xf32>
    %64 = arith.addf %62, %63 : vector<32x128xf32>
    %cst_29 = arith.constant 0.000000e+00 : f32
    %65 = vector.broadcast %cst_29 : f32 to vector<32x128xf32>
    %66 = arith.maximumf %64, %65 : vector<32x128xf32>
    %67 = tpu.iota {dimensions = array<i32: 0>} : vector<32x128xi32>
    %c16_i32_30 = arith.constant 16 : i32
    %c0_i32_31 = arith.constant 0 : i32
    %68 = arith.cmpi eq, %c16_i32_30, %c0_i32_31 : i32
    %c1_i32_32 = arith.constant 1 : i32
    %69 = arith.select %68, %c1_i32_32, %c16_i32_30 : i32
    %70 = vector.broadcast %69 : i32 to vector<32x128xi32>
    %71 = arith.remsi %67, %70 : vector<32x128xi32>
    %c0_i32_33 = arith.constant 0 : i32
    %72 = vector.broadcast %c0_i32_33 : i32 to vector<32x128xi32>
    %73 = arith.cmpi ne, %71, %72 : vector<32x128xi32>
    %c0_i32_34 = arith.constant 0 : i32
    %74 = vector.broadcast %c0_i32_34 : i32 to vector<32x128xi32>
    %75 = arith.cmpi slt, %71, %74 : vector<32x128xi32>
    %c0_i32_35 = arith.constant 0 : i32
    %76 = arith.cmpi slt, %69, %c0_i32_35 : i32
    %77 = vector.broadcast %76 : i1 to vector<32x128xi1>
    %78 = vector.broadcast %77 : vector<32x128xi1> to vector<32x128xi1>
    %79 = arith.xori %75, %78 : vector<32x128xi1>
    %80 = arith.andi %79, %73 : vector<32x128xi1>
    %81 = vector.broadcast %69 : i32 to vector<32x128xi32>
    %82 = arith.addi %71, %81 : vector<32x128xi32>
    %83 = arith.select %80, %82, %71 : vector<32x128xi1>, vector<32x128xi32>
    %c0_i32_36 = arith.constant 0 : i32
    %84 = vector.broadcast %c0_i32_36 : i32 to vector<32x128xi32>
    %85 = arith.cmpi sgt, %83, %84 : vector<32x128xi32>
    %c1_i32_37 = arith.constant 1 : i32
    %86 = tpu.dynamic_rotate %66 by %c1_i32_37 dim 0 : vector<32x128xf32>, i32 -> vector<32x128xf32>
    %cst_38 = arith.constant 0.000000e+00 : f32
    %87 = vector.broadcast %cst_38 : f32 to vector<32x128xf32>
    %88 = arith.select %85, %86, %87 : vector<32x128xi1>, vector<32x128xf32>
    %c15_i32_39 = arith.constant 15 : i32
    %89 = vector.broadcast %c15_i32_39 : i32 to vector<32x128xi32>
    %90 = arith.cmpi slt, %83, %89 : vector<32x128xi32>
    %c31_i32_40 = arith.constant 31 : i32
    %91 = tpu.dynamic_rotate %66 by %c31_i32_40 dim 0 : vector<32x128xf32>, i32 -> vector<32x128xf32>
    %cst_41 = arith.constant 0.000000e+00 : f32
    %92 = vector.broadcast %cst_41 : f32 to vector<32x128xf32>
    %93 = arith.select %90, %91, %92 : vector<32x128xi1>, vector<32x128xf32>
    %94 = tpu.concatenate %88, %66, %93 in 1 : vector<32x128xf32>, vector<32x128xf32>, vector<32x128xf32> -> vector<32x384xf32>
    %95 = arith.truncf %94 : vector<32x384xf32> to vector<32x384xbf16>
    %cst_42 = arith.constant dense<0.000000e+00> : vector<32x128xf32>
    %96 = tpu.matmul %95, %5, %cst_42 {dimension_numbers = #tpu.dot_dimension_numbers<[1], [0], [0], [1], [0, 0, 1, 1], [], []>} : vector<32x384xbf16>, vector<384x128xbf16>, vector<32x128xf32> -> vector<32x128xf32>
    %cst_43 = arith.constant dense<0.000000e+00> : vector<128xf32>
    %97 = vector.multi_reduction <add>, %96, %cst_43 [0] : vector<32x128xf32> to vector<128xf32>
    %98 = vector.shape_cast %97 : vector<128xf32> to vector<1x128xf32>
    %99 = arith.mulf %96, %96 : vector<32x128xf32>
    %cst_44 = arith.constant dense<0.000000e+00> : vector<128xf32>
    %100 = vector.multi_reduction <add>, %99, %cst_44 [0] : vector<32x128xf32> to vector<128xf32>
    %101 = vector.shape_cast %100 : vector<128xf32> to vector<1x128xf32>
    %cst_45 = arith.constant dense<0.000000e+00> : vector<1x128xf32>
    %102 = tpu.matmul %98, %1, %cst_45 {dimension_numbers = #tpu.dot_dimension_numbers<[1], [0], [0], [1], [0, 0, 1, 1], [], []>} : vector<1x128xf32>, vector<128x128xf32>, vector<1x128xf32> -> vector<1x128xf32>
    %cst_46 = arith.constant dense<0.000000e+00> : vector<1x128xf32>
    %103 = tpu.matmul %101, %1, %cst_46 {dimension_numbers = #tpu.dot_dimension_numbers<[1], [0], [0], [1], [0, 0, 1, 1], [], []>} : vector<1x128xf32>, vector<128x128xf32>, vector<1x128xf32> -> vector<1x128xf32>
    %104 = arith.mulf %102, %102 : vector<1x128xf32>
    %105 = arith.subf %103, %104 : vector<1x128xf32>
    %cst_47 = arith.constant 9.99999974E-6 : f32
    %106 = vector.broadcast %cst_47 : f32 to vector<1x128xf32>
    %107 = arith.addf %105, %106 : vector<1x128xf32>
    %108 = math.rsqrt %107 : vector<1x128xf32>
    %109 = arith.mulf %108, %6 : vector<1x128xf32>
    %110 = arith.mulf %102, %109 : vector<1x128xf32>
    %111 = arith.subf %7, %110 : vector<1x128xf32>
    %112 = vector.broadcast %109 : vector<1x128xf32> to vector<32x128xf32>
    %113 = arith.mulf %96, %112 : vector<32x128xf32>
    %114 = vector.broadcast %111 : vector<1x128xf32> to vector<32x128xf32>
    %115 = arith.addf %113, %114 : vector<32x128xf32>
    %116 = arith.truncf %0 : vector<32x64xf32> to vector<32x64xbf16>
    %c0_48 = arith.constant 0 : index
    %c0_49 = arith.constant 0 : index
    %117 = vector.load %arg8[%c0_48, %c0_49] : memref<64x128xbf16, #tpu.memory_space<vmem>>, vector<64x128xbf16>
    %cst_50 = arith.constant dense<0.000000e+00> : vector<32x128xf32>
    %118 = tpu.matmul %116, %117, %cst_50 {dimension_numbers = #tpu.dot_dimension_numbers<[1], [0], [0], [1], [0, 0, 1, 1], [], []>} : vector<32x64xbf16>, vector<64x128xbf16>, vector<32x128xf32> -> vector<32x128xf32>
    %c0_51 = arith.constant 0 : index
    %c0_52 = arith.constant 0 : index
    %119 = vector.load %arg9[%c0_51, %c0_52] : memref<1x128xf32, #tpu.memory_space<vmem>>, vector<1x128xf32>
    %c0_53 = arith.constant 0 : index
    %c0_54 = arith.constant 0 : index
    %120 = vector.load %arg10[%c0_53, %c0_54] : memref<1x128xf32, #tpu.memory_space<vmem>>, vector<1x128xf32>
    %cst_55 = arith.constant dense<0.000000e+00> : vector<128xf32>
    %121 = vector.multi_reduction <add>, %118, %cst_55 [0] : vector<32x128xf32> to vector<128xf32>
    %122 = vector.shape_cast %121 : vector<128xf32> to vector<1x128xf32>
    %123 = arith.mulf %118, %118 : vector<32x128xf32>
    %cst_56 = arith.constant dense<0.000000e+00> : vector<128xf32>
    %124 = vector.multi_reduction <add>, %123, %cst_56 [0] : vector<32x128xf32> to vector<128xf32>
    %125 = vector.shape_cast %124 : vector<128xf32> to vector<1x128xf32>
    %cst_57 = arith.constant dense<0.000000e+00> : vector<1x128xf32>
    %126 = tpu.matmul %122, %1, %cst_57 {dimension_numbers = #tpu.dot_dimension_numbers<[1], [0], [0], [1], [0, 0, 1, 1], [], []>} : vector<1x128xf32>, vector<128x128xf32>, vector<1x128xf32> -> vector<1x128xf32>
    %cst_58 = arith.constant dense<0.000000e+00> : vector<1x128xf32>
    %127 = tpu.matmul %125, %1, %cst_58 {dimension_numbers = #tpu.dot_dimension_numbers<[1], [0], [0], [1], [0, 0, 1, 1], [], []>} : vector<1x128xf32>, vector<128x128xf32>, vector<1x128xf32> -> vector<1x128xf32>
    %128 = arith.mulf %126, %126 : vector<1x128xf32>
    %129 = arith.subf %127, %128 : vector<1x128xf32>
    %cst_59 = arith.constant 9.99999974E-6 : f32
    %130 = vector.broadcast %cst_59 : f32 to vector<1x128xf32>
    %131 = arith.addf %129, %130 : vector<1x128xf32>
    %132 = math.rsqrt %131 : vector<1x128xf32>
    %133 = arith.mulf %132, %119 : vector<1x128xf32>
    %134 = arith.mulf %126, %133 : vector<1x128xf32>
    %135 = arith.subf %120, %134 : vector<1x128xf32>
    %136 = vector.broadcast %133 : vector<1x128xf32> to vector<32x128xf32>
    %137 = arith.mulf %118, %136 : vector<32x128xf32>
    %138 = vector.broadcast %135 : vector<1x128xf32> to vector<32x128xf32>
    %139 = arith.addf %137, %138 : vector<32x128xf32>
    %140 = arith.addf %139, %115 : vector<32x128xf32>
    %c0_60 = arith.constant 0 : index
    %c0_61 = arith.constant 0 : index
    %141 = vector.load %arg11[%c0_60, %c0_61] : memref<32x128xf32, #tpu.memory_space<vmem>>, vector<32x128xf32>
    tpu.vector_store %arg11[%c0_60, %c0_61], %140 {strides = array<i32>} : memref<32x128xf32, #tpu.memory_space<vmem>>, vector<32x128xf32>,
    return
  }
}

</mosaic_0001>

<bundles_post_ra>
// kernel: residual_block.1
= control target key start
LH: loop header
LB: loop body
LE: loop exit
PB: predicated region body
PF: predicated region fallthrough
CT: control target
= control target key end

     0   :  { %v135_v0 = vlaneseq  ;;  %v2106_v2 = vmov 0.0|0.0   ;;  %vm250_vm0 = vcmask 523264   ;;  %vm2107_vm7 = vmmov 0   ;;  %s2673_s2 = inlined_call_operand.vmem [shape: bf16[192,128], index: 2, kind: input, shape index: {}]   ;;  %s2674_s0 = inlined_call_operand.vmem [shape: f32[32,64], index: 0, kind: input, shape index: {}]   ;;  %s2675_s1 = inlined_call_operand.vmem [shape: f32[128,128], index: 1, kind: input, shape index: {}]   ;;  %s2676_s5 = inlined_call_operand.vmem [shape: bf16[384,128], index: 5, kind: input, shape index: {}]   ;;  %s2677_s3 = inlined_call_operand.vmem [shape: f32[1,128], index: 3, kind: input, shape index: {}]   ;;  %s2678_s4 = inlined_call_operand.vmem [shape: f32[1,128], index: 4, kind: input, shape index: {}]   ;;  %s2679_s8 = inlined_call_operand.vmem [shape: bf16[64,128], index: 8, kind: input, shape index: {}]   ;;  %s2680_s6 = inlined_call_operand.vmem [shape: f32[1,128], index: 6, kind: input, shape index: {}]   ;;  %s2681_s7 = inlined_call_operand.vmem [shape: f32[1,128], index: 7, kind: input, shape index: {}]   ;;  %s2682_s9 = inlined_call_operand.vmem [shape: f32[1,128], index: 9, kind: input, shape index: {}]   ;;  %s2683_s10 = inlined_call_operand.vmem [shape: f32[1,128], index: 10, kind: input, shape index: {}]   ;;  %s2684_s11 = inlined_call_operand.vmem [shape: f32[32,128], index: 11, kind: output, shape index: {}]  }
   0x1   :  { %v2060_v1 = vld [vmem:[%s2673_s2 + $0x20] sm:$0xff]   ;;  %1904 = vmatprep.subr.bf16.mxu1 %v2106_v2  ;;  %v2061_v3 = vld [vmem:[%s2673_s2 + $0x28] sm:$0xff]   ;;  %v2062_v5 = vld [vmem:[%s2673_s2 + $0x30] sm:$0xff]   ;;  %vm2109_vm8 = vmmov 1  }
   0x2   :  { %v2177_v4 = vshrl.u32 %v135_v0, 7  ;;  %1626 = vmatprep.subr.bf16.mxu0 %v2060_v1  ;;  %v2185_v6 = vld [vmem:[%s2674_s0] sm:$0xff]  ;;  %v2190_v7 = vld [vmem:[%s2674_s0 + $0x8] sm:$0xff]  ;;  %v2201_v11 = vld [vmem:[%s2674_s0 + $0x18] sm:$0xff] }
   0x3   :  { %1627 = vmatpush3.bf16.msra.mxu0 %v2060_v1  ;;  %v192_v8 = vrot.slane %v2185_v6, 7  ;;  %v2196_v10 = vpack.c.bf16 %v2190_v7, %v2185_v6  ;;  %v195_v12 = vrot.slane %v2201_v11, 7  ;;  %v2063_v13 = vld [vmem:[%s2673_s2 + $0x38] sm:$0xff]   ;;  %v193_v14 = vrot.slane %v2190_v7, 7  ;;  %v2220_v17 = vld [vmem:[%s2674_s0 + $0x10] sm:$0xff]  ;;  %v2064_v18 = vld [vmem:[%s2673_s2] sm:$0xff]  }
   0x4   :  { %1628 = vmatprep.subr.bf16.mxu0 %v2061_v3  ;;  %v144_v9 = vand.u32 15, %v2177_v4  ;;  %vm196_vm1 = vcmp.lt.s32.totalorder %v2177_v4, 1  ;;  %v2231_v21 = vpack.c.bf16 %v2201_v11, %v2220_v17  ;;  %v43_v22 = vld [vmem:[%s2675_s1] sm:$0xff]  ;;  %v44_v24 = vld [vmem:[%s2675_s1 + $0x8] sm:$0xff]  ;;  %v45_v25 = vld [vmem:[%s2675_s1 + $0x10] sm:$0xff]  ;;  %v138_v28 = vadd.s32 16, %v2177_v4 }
   0x5   :  { %1634 = vmatprep.mubr.msk.bf16.mxu0 %vm250_vm0, %v2196_v10  ;;  %v200_v16 = vsel %vm196_vm1, %v195_v12, %v192_v8  ;;  %v199_v19 = vsel %vm196_vm1, %v192_v8, %v193_v14  ;;  %v46_v26 = vld [vmem:[%s2675_s1 + $0x18] sm:$0xff]  ;;  %v2065_v27 = vld [vmem:[%s2673_s2 + $0x8] sm:$0xff]   ;;  %v2249_v29 = vpack.c.bf16 %v44_v24, %v43_v22  ;;  %v137_v30 = vadd.s32 8, %v2177_v4  ;;  %v47_v32 = vld [vmem:[%s2675_s1 + $0x20] sm:$0xff] }
   0x6   :  { %vm2211_vm2 = vcmp.gt.s32.totalorder %v144_v9, 0  ;;  %v2255_v31 = vpack.c.bf16 %v46_v26, %v45_v25  ;;  %v48_v33 = vld [vmem:[%s2675_s1 + $0x28] sm:$0xff]  ;;  %v194_v34 = vrot.slane %v2220_v17, 7  ;;  %v2066_v35 = vld [vmem:[%s2673_s2 + $0x10] sm:$0xff]   ;;  %v158_v36 = vand.u32 15, %v138_v28  ;;  %v2067_v42 = vld [vmem:[%s2673_s2 + $0x18] sm:$0xff]  }
   0x7   :  { %1629 = vmatpush3.bf16.msra.mxu0 %v2061_v3  ;;  %v201_v20 = vsel %vm2211_vm2, %v200_v16, 0.0  ;;  %1906 = vmatpush3.bf16.msra.mxu1 %v2249_v29  ;;  %v210_v37 = vrot.slane %v2190_v7, 1  ;;  %v211_v38 = vrot.slane %v2220_v17, 1  ;;  %v151_v39 = vand.u32 15, %v137_v30  ;;  %v2068_v49 = vld [vmem:[%s2673_s2 + $0x40] sm:$0xff]   ;;  %v2069_v54 = vld [vmem:[%s2673_s2 + $0x48] sm:$0xff]   ;;  %vm1444_vm9 = vmpackc.low %vm2109_vm8, %vm2211_vm2 }
   0x8   :  { %1630 = vmatprep.subr.bf16.mxu0 %v2062_v5  ;;  %v222_v23 = vpack.c.bf16 %v199_v19, %v201_v20  ;;  %1907 = vmatprep.subr.bf16.mxu1 %v2106_v2  ;;  %vm213_vm3 = vcmp.lt.s32.totalorder %v2177_v4, 7  ;;  %v2273_v40 = vpack.c.bf16 %v48_v33, %v47_v32  ;;  %v209_v41 = vrot.slane %v2185_v6, 1  ;;  %v2070_v57 = vld [vmem:[%s2673_s2 + $0x50] sm:$0xff]   ;;  %v2071_v59 = vld [vmem:[%s2673_s2 + $0x58] sm:$0xff]   ;;  %v51_v6 = vld [vmem:[%s2675_s1 + $0x40] sm:$0xff] }
   0x9   :  { %vm2280_vm4 = vcmp.gt.s32.totalorder %v158_v36, 0  ;;  %v198_v44 = vsel %vm196_vm1, %v193_v14, %v194_v34  ;;  %vm2286_vm5 = vcmp.lt.s32.totalorder %v151_v39, 15  ;;  %v215_v46 = vsel %vm213_vm3, %v210_v37, %v211_v38  ;;  %v49_v1 = vld [vmem:[%s2675_s1 + $0x30] sm:$0xff]  ;;  %v50_v3 = vld [vmem:[%s2675_s1 + $0x38] sm:$0xff]  ;;  %v52_v7 = vld [vmem:[%s2675_s1 + $0x48] sm:$0xff] }
   0xa   :  { %v197_v47 = vsel %vm196_vm1, %v194_v34, %v195_v12  ;;  %v203_v48 = vsel %vm2280_vm4, %v198_v44, 0.0  ;;  %v216_v50 = vsel %vm213_vm3, %v209_v41, %v210_v37  ;;  %v219_v51 = vsel %vm2286_vm5, %v215_v46, 0.0  ;;  %v53_v9 = vld [vmem:[%s2675_s1 + $0x50] sm:$0xff]  ;;  %v56_v14 = vld [vmem:[%s2675_s1 + $0x68] sm:$0xff]  ;;  %vm1450_vm10 = vmpackc.low %vm2286_vm5, %vm2109_vm8 }
   0xb   :  { %1631 = vmatpush3.bf16.msra.mxu0 %v2062_v5  ;;  %1909 = vmatpush3.bf16.msra.mxu1 %v2255_v31  ;;  %v223_v52 = vpack.c.bf16 %v197_v47, %v203_v48  ;;  %v385_v53 = vpack.c.bf16 %v219_v51, %v216_v50  ;;  %v139_v55 = vadd.s32 24, %v2177_v4  ;;  %v212_v56 = vrot.slane %v2201_v11, 1  ;;  %v54_v11 = vld [vmem:[%s2675_s1 + $0x58] sm:$0xff]  ;;  %v57_v17 = vld [vmem:[%s2675_s1 + $0x70] sm:$0xff]  ;;  %vm1447_vm12 = vmpackc.low %vm2109_vm8, %vm2280_vm4 }
   0xc   :  { %1632 = vmatprep.subr.bf16.mxu0 %v2063_v13  ;;  %1910 = vmatprep.subr.bf16.mxu1 %v2106_v2  ;;  %v2335_v5 = vpack.c.bf16 %v50_v3, %v49_v1  ;;  %v2345_v8 = vpack.c.bf16 %v52_v7, %v51_v6  ;;  %v2355_v12 = vpack.c.bf16 %v54_v11, %v53_v9  ;;  %v2108_v19 = vmov 0.0   ;;  %v2083_v1 = vld [vmem:[%s2676_s5 + $0x98] sm:$0xff]   ;;  %v2084_v3 = vld [vmem:[%s2676_s5 + $0x60] sm:$0xff]   ;;  %v2087_v9 = vld [vmem:[%s2676_s5 + $0x68] sm:$0xff]  }
   0xd   :  { %v165_v58 = vand.u32 15, %v139_v55  ;;  %v217_v61 = vsel %vm213_vm3, %v212_v56, %v209_v41  ;;  %v214_v62 = vsel %vm213_vm3, %v211_v38, %v212_v56  ;;  %1694 = vmatprep.mubr.msk.f32.mxu1 %vm2107_vm7, %v2108_v19  ;;  %v2074_v55 = vld [vmem:[%s2676_s5 + $0x80] sm:$0xff]   ;;  %v2075_v56 = vld [vmem:[%s2676_s5 + $0x48] sm:$0xff]  }
   0xe   :  { %v2085_v6 = vld [vmem:[%s2676_s5 + $0x20] sm:$0xff]   ;;  %v2088_v11 = vld [vmem:[%s2676_s5 + $0x28] sm:$0xff]  }
   0xf   :  { %1633 = vmatpush3.bf16.msra.mxu0 %v2063_v13  ;;  %1912 = vmatpush3.bf16.msra.mxu1 %v2273_v40  ;;  %vm2318_vm6 = vcmp.lt.s32.totalorder %v165_v58, 15  ;;  %v55_v13 = vld [vmem:[%s2675_s1 + $0x60] sm:$0xff]  ;;  %v2077_v58 = vld [vmem:[%s2676_s5 + $0x88] sm:$0xff]  }
  0x10   :  { %1638 = vmatprep.subr.bf16.mxu0 %v2064_v18  ;;  %1913 = vmatprep.subr.bf16.mxu1 %v2106_v2  ;;  %v221_v63 = vsel %vm2318_vm6, %v217_v61, 0.0  ;;  %v2365_v16 = vpack.c.bf16 %v56_v14, %v55_v13  ;;  %v2079_v61 = vld [vmem:[%s2676_s5 + $0x10] sm:$0xff]   ;;  %v2086_v7 = vld [vmem:[%s2676_s5 + $0xa0] sm:$0xff]   ;;  %v2089_v13 = vld [vmem:[%s2676_s5 + $0xa8] sm:$0xff]  }
  0x11   :  { %v386_v0 = vpack.c.bf16 %v221_v63, %v214_v62  ;;  %v2080_v62 = vld [vmem:[%s2676_s5 + $0x90] sm:$0xff]   ;;  %v2081_v63 = vld [vmem:[%s2676_s5 + $0x58] sm:$0xff]   ;;  %vm1453_vm11 = vmpackc.low %vm2318_vm6, %vm2109_vm8 }
  0x12   :  { %1635 = vmatmul.mubr.msk.bf16.vlgmr.msra.gmra.mrb[0].mxu0 %vm250_vm0, %v2231_v21  ;;  %v2090_v14 = vld [vmem:[%s2676_s5 + $0x70] sm:$0xff]  }
  0x13   :  { %1639 = vmatpush3.bf16.msra.mxu0 %v2064_v18  ;;  %1646 = vmatprep.mubr.msk.bf16.mxu0 %vm250_vm0, %v222_v23  ;;  %v58_v18 = vld [vmem:[%s2675_s1 + $0x78] sm:$0xff] }
  0x14   :  { %1640 = vmatprep.subr.bf16.mxu0 %v2065_v27  ;;  %1915 = vmatpush3.bf16.msra.mxu1 %v2335_v5  ;;  %v2376_v20 = vpack.c.bf16 %v58_v18, %v57_v17  ;;  %v2092_v17 = vld [vmem:[%s2676_s5 + $0xb0] sm:$0xff]  }
  0x15   :  { %1916 = vmatprep.subr.bf16.mxu1 %v2106_v2  ;;  %v2091_v18 = vld [vmem:[%s2676_s5 + $0x30] sm:$0xff]  }
  0x17   :  { %1641 = vmatpush3.bf16.msra.mxu0 %v2065_v27 }
  0x18   :  { %1642 = vmatprep.subr.bf16.mxu0 %v2066_v35  ;;  %1918 = vmatpush3.bf16.msra.mxu1 %v2345_v8 }
  0x19   :  { %1919 = vmatprep.subr.bf16.mxu1 %v2106_v2 }
  0x1b   :  { %1643 = vmatpush3.bf16.msra.mxu0 %v2066_v35 }
  0x1c   :  { %1644 = vmatprep.subr.bf16.mxu0 %v2067_v42  ;;  %1921 = vmatpush3.bf16.msra.mxu1 %v2355_v12 }
  0x1d   :  { %1922 = vmatprep.subr.bf16.mxu1 %v2106_v2 }
  0x1f   :  { %1645 = vmatpush3.bf16.msra.mxu0 %v2067_v42 }
  0x20   :  { %1650 = vmatprep.subr.bf16.mxu0 %v2068_v49  ;;  %1924 = vmatpush3.bf16.msra.mxu1 %v2365_v16 }
  0x21   :  { %1925 = vmatprep.subr.bf16.mxu1 %v2106_v2 }
  0x22   :  { %1647 = vmatmul.mubr.msk.bf16.vlgmr.msra.gmra.mrb[0].mxu0 %vm250_vm0, %v223_v52 }
  0x23   :  { %1651 = vmatpush3.bf16.msra.mxu0 %v2068_v49  ;;  %1658 = vmatprep.mubr.msk.bf16.mxu0 %vm250_vm0, %v385_v53  ;;  %v2072_v53 = vld [vmem:[%s2676_s5 + $0x40] sm:$0xff]  }
  0x24   :  { %1652 = vmatprep.subr.bf16.mxu0 %v2069_v54  ;;  %1927 = vmatpush3.bf16.msra.mxu1 %v2376_v20 }
  0x25   :  { %1928 = vmatprep.subr.bf16.mxu1 %v2106_v2 }
  0x27   :  { %1653 = vmatpush3.bf16.msra.mxu0 %v2069_v54  ;;  %v2073_v54 = vld [vmem:[%s2676_s5] sm:$0xff]  }
  0x28   :  { %1654 = vmatprep.subr.bf16.mxu0 %v2070_v57 }
  0x2b   :  { %1655 = vmatpush3.bf16.msra.mxu0 %v2070_v57  ;;  %v2076_v57 = vld [vmem:[%s2676_s5 + $0x8] sm:$0xff]  }
  0x2c   :  { %1656 = vmatprep.subr.bf16.mxu0 %v2071_v59 }
  0x2f   :  { %1657 = vmatpush3.bf16.msra.mxu0 %v2071_v59  ;;  %v2078_v59 = vld [vmem:[%s2676_s5 + $0x50] sm:$0xff]  }
  0x30   :  { %1514 = vmatprep.subr.bf16.mxu0 %v2072_v53 }
  0x32   :  { %1659 = vmatmul.mubr.msk.bf16.vlgmr.msra.gmra.mrb[0].mxu0 %vm250_vm0, %v386_v0  ;;  %v2082_v0 = vld [vmem:[%s2676_s5 + $0x18] sm:$0xff]  }
  0x33   :  { %1515 = vmatpush3.bf16.msra.mxu0 %v2073_v54 }
  0x34   :  { %1516 = vmatprep.subr.bf16.mxu0 %v2075_v56 }
  0x37   :  { %1517 = vmatpush3.bf16.msra.mxu0 %v2076_v57 }
  0x38   :  { %1518 = vmatprep.subr.bf16.mxu0 %v2078_v59 }
  0x3b   :  { %1519 = vmatpush3.bf16.msra.mxu0 %v2079_v61 }
  0x3c   :  { %1520 = vmatprep.subr.bf16.mxu0 %v2081_v63 }
  0x3f   :  { %1521 = vmatpush3.bf16.msra.mxu0 %v2082_v0 }
  0x40   :  { %1522 = vmatprep.subr.bf16.mxu0 %v2084_v3 }
  0x43   :  { %1523 = vmatpush3.bf16.msra.mxu0 %v2085_v6 }
  0x44   :  { %1524 = vmatprep.subr.bf16.mxu0 %v2087_v9 }
  0x47   :  { %1525 = vmatpush3.bf16.msra.mxu0 %v2088_v11 }
  0x48   :  { %1526 = vmatprep.subr.bf16.mxu0 %v2090_v14 }
  0x4b   :  { %1527 = vmatpush3.bf16.msra.mxu0 %v2091_v18 }
 0x105   :  { %v2381_v22 = vpop.f32.mrb[0].mxu0 }
 0x106   :  { %v2383_v23 = vpop.f32.mrb[1].mxu0  ;;  %v481_v30 = vmul.f32 %v2381_v22, %v2381_v22 }
 0x107   :  { %v2385_v24 = vpop.f32.mrb[2].mxu0  ;;  %v479_v26 = vmul.f32 %v2383_v23, %v2383_v23 }
 0x108   :  { %v2387_v25 = vpop.f32.mrb[3].mxu0  ;;  %v482_v34 = vmul.f32 %v2385_v24, %v2385_v24 }
 0x109   :  { %v470_v27 = vadd.f32 %v2387_v25, %v2383_v23  ;;  %v480_v28 = vmul.f32 %v2387_v25, %v2387_v25 }
 0x10b   :  { %v471_v32 = vadd.f32 %v2381_v22, %v470_v27  ;;  %v483_v33 = vadd.f32 %v480_v28, %v479_v26  ;;  %v2093_v26 = vld [vmem:[%s2676_s5 + $0x78] sm:$0xff]  }
 0x10c   :  { %v2094_v27 = vld [vmem:[%s2676_s5 + $0x38] sm:$0xff]   ;;  %1528 = vmatprep.subr.bf16.mxu0 %v2093_v26 }
 0x10d   :  { %v472_v35 = vadd.f32 %v2385_v24, %v471_v32  ;;  %v484_v36 = vadd.f32 %v483_v33, %v481_v30  ;;  %v2095_v28 = vld [vmem:[%s2676_s5 + $0xb8] sm:$0xff]   ;;  %1529 = vmatpush3.bf16.msra.mxu0 %v2094_v27 }
 0x10e   :  { %1952 = vmatprep.subr.bf16.mxu0 %v2106_v2 }
 0x10f   :  { %v473_v37 = vrot.slane %v472_v35, 4  ;;  %v485_v38 = vadd.f32 %v484_v36, %v482_v34 }
 0x111   :  { %v474_v39 = vadd.f32 %v473_v37, %v472_v35  ;;  %v486_v47 = vrot.slane %v485_v38, 4 }
 0x113   :  { %v475_v41 = vrot.slane %v474_v39, 2  ;;  %v487_v48 = vadd.f32 %v486_v47, %v485_v38  ;;  %v83_v38 = vld [vmem:[%s2677_s3] sm:$0x1] }
 0x115   :  { %v476_v42 = vadd.f32 %v475_v41, %v474_v39  ;;  %v488_v49 = vrot.slane %v487_v48, 2  ;;  %v2496_v39 = vsub.s32 0, %v2177_v4  ;;  %v2096_v4 = vld [vmem:[%s2679_s8] sm:$0xff]  }
 0x117   :  { %v477_v44 = vrot.slane %v476_v42, 1  ;;  %v489_v50 = vadd.f32 %v488_v49, %v487_v48 }
 0x119   :  { %v478_v46 = vadd.f32 %v477_v44, %v476_v42  ;;  %v490_v51 = vrot.slane %v489_v50, 1  ;;  %v84_v44 = vld [vmem:[%s2678_s4] sm:$0x1] }
 0x11b   :  { %1695 = vmatmul.mubr.f32.vlgmr.msra.gmra.mrb[0].mxu1 %v478_v46  ;;  %v491_v52 = vadd.f32 %v490_v51, %v489_v50 }
 0x11c   :  { %1930 = vmatpush3.bf16.msra.mxu1 %v2249_v29  ;;  %1729 = vmatprep.mubr.msk.f32.mxu1 %vm2107_vm7, %v2108_v19 }
 0x11d   :  { %1931 = vmatprep.subr.bf16.mxu1 %v2106_v2 }
 0x120   :  { %1933 = vmatpush3.bf16.msra.mxu1 %v2255_v31 }
 0x121   :  { %1934 = vmatprep.subr.bf16.mxu1 %v2106_v2 }
 0x124   :  { %1936 = vmatpush3.bf16.msra.mxu1 %v2273_v40 }
 0x125   :  { %1937 = vmatprep.subr.bf16.mxu1 %v2106_v2 }
 0x128   :  { %1939 = vmatpush3.bf16.msra.mxu1 %v2335_v5 }
 0x129   :  { %1940 = vmatprep.subr.bf16.mxu1 %v2106_v2 }
 0x12c   :  { %1942 = vmatpush3.bf16.msra.mxu1 %v2345_v8 }
 0x12d   :  { %1943 = vmatprep.subr.bf16.mxu1 %v2106_v2 }
 0x130   :  { %1945 = vmatpush3.bf16.msra.mxu1 %v2355_v12 }
 0x131   :  { %1946 = vmatprep.subr.bf16.mxu1 %v2106_v2 }
 0x134   :  { %1948 = vmatpush3.bf16.msra.mxu1 %v2365_v16 }
 0x135   :  { %1949 = vmatprep.subr.bf16.mxu1 %v2106_v2 }
 0x138   :  { %1951 = vmatpush3.bf16.msra.mxu1 %v2376_v20 }
 0x139   :  { %1732 = vmatprep.subr.bf16.mxu1 %v2074_v55 }
 0x13b   :  { %1730 = vmatmul.mubr.f32.vlgmr.msra.gmra.mrb[2].mxu1 %v491_v52 }
 0x13c   :  { %1733 = vmatpush3.bf16.msra.mxu1 %v2074_v55 }
 0x13d   :  { %1734 = vmatprep.subr.bf16.mxu1 %v2077_v58 }
 0x140   :  { %1735 = vmatpush3.bf16.msra.mxu1 %v2077_v58 }
 0x141   :  { %1736 = vmatprep.subr.bf16.mxu1 %v2080_v62 }
 0x144   :  { %1737 = vmatpush3.bf16.msra.mxu1 %v2080_v62 }
 0x145   :  { %1738 = vmatprep.subr.bf16.mxu1 %v2083_v1 }
 0x148   :  { %1739 = vmatpush3.bf16.msra.mxu1 %v2083_v1 }
 0x149   :  { %1740 = vmatprep.subr.bf16.mxu1 %v2086_v7 }
 0x14c   :  { %1741 = vmatpush3.bf16.msra.mxu1 %v2086_v7 }
 0x14d   :  { %1742 = vmatprep.subr.bf16.mxu1 %v2089_v13 }
 0x150   :  { %1743 = vmatpush3.bf16.msra.mxu1 %v2089_v13 }
 0x151   :  { %1744 = vmatprep.subr.bf16.mxu1 %v2092_v17 }
 0x154   :  { %1745 = vmatpush3.bf16.msra.mxu1 %v2092_v17 }
 0x155   :  { %1746 = vmatprep.subr.bf16.mxu1 %v2095_v28 }
 0x158   :  { %1747 = vmatpush3.bf16.msra.mxu1 %v2095_v28 }
 0x159   :  { %1976 = vmatprep.subr.bf16.mxu1 %v2106_v2 }
 0x1ee   :  { %v558_v30 = vpop.f32.mrb[0].mxu1 }
 0x1ef   :  { %v1696_v32 = vpop.f32.mrb[1].mxu1  ;;  %v632_v33 = vmul.f32 %v558_v30, %v558_v30 }
 0x20e   :  { %v628_v34 = vpop.f32.mrb[2].mxu1 }
 0x20f   :  { %v633_v35 = vsub.f32 %v628_v34, %v632_v33  ;;  %v1731_v36 = vpop.f32.mrb[3].mxu1 }
 0x211   :  { %v634_v37 = vadd.f32 1e-05, %v633_v35 }
 0x213   :  { %2100 = vrsqrt.f32 %v634_v37 }
 0x21d   :  { %v2101_v41 = vpop.eup %2100 }
 0x21e   :  { %v636_v42 = vmul.f32 %v2101_v41, %v83_v38 }
 0x220   :  { %v637_v46 = vmul.f32 %v636_v42, %v558_v30  ;;  %v642_v47 = vrot.slane %v636_v42, %v2496_v39 }
 0x222   :  { %v638_v48 = vsub.f32 %v84_v44, %v637_v46  ;;  %v646_v49 = vmul.f32 %v2385_v24, %v642_v47  ;;  %v643_v50 = vmul.f32 %v642_v47, %v2383_v23  ;;  %v644_v51 = vmul.f32 %v642_v47, %v2387_v25 }
 0x223   :  { %v645_v52 = vmul.f32 %v2381_v22, %v642_v47 }
 0x224   :  { %v651_v53 = vrot.slane %v638_v48, %v2496_v39 }
 0x226   :  { %v653_v54 = vadd.f32 %v651_v53, %v643_v50  ;;  %v654_v55 = vadd.f32 %v651_v53, %v644_v51  ;;  %v656_v56 = vadd.f32 %v651_v53, %v646_v49  ;;  %v655_v57 = vadd.f32 %v651_v53, %v645_v52 }
 0x228   :  { %v657_v58 = vmax.f32 %v653_v54, 0.0  ;;  %v658_v59 = vmax.f32 %v654_v55, 0.0  ;;  %v660_v61 = vmax.f32 %v656_v56, 0.0  ;;  %v659_v62 = vmax.f32 %v655_v57, 0.0 }
 0x22a   :  { %v661_v63 = vrot.slane %v657_v58, 7  ;;  %v662_v0 = vrot.slane %v658_v59, 7  ;;  %v686_v1 = vpack.c.bf16 %v658_v59, %v657_v58  ;;  %v664_v24 = vrot.slane %v660_v61, 7 }
 0x22b   :  { %v673_v3 = vrot.slane %v657_v58, 1  ;;  %v674_v23 = vrot.slane %v658_v59, 1  ;;  %v675_v6 = vrot.slane %v659_v62, 1  ;;  %v689_v25 = vpack.c.bf16 %v660_v61, %v659_v62 }
 0x22c   :  { %867 = vmatprep.mubr.bf16.mxu0 %v686_v1  ;;  %v667_v22 = vsel %vm196_vm1, %v661_v63, %v662_v0  ;;  %v668_v7 = vsel %vm196_vm1, %v664_v24, %v661_v63  ;;  %v676_v9 = vrot.slane %v660_v61, 1  ;;  %v663_v11 = vrot.slane %v659_v62, 7 }
 0x22d   :  { %v1445_v13 = vpack.c.bf16 %v667_v22, %v668_v7  ;;  %v678_v14 = vsel %vm213_vm3, %v674_v23, %v675_v6  ;;  %v679_v17 = vsel %vm213_vm3, %v673_v3, %v674_v23 }
 0x22e   :  { %v1451_v18 = vpack.c.bf16 %v678_v14, %v679_v17  ;;  %v677_v26 = vsel %vm213_vm3, %v675_v6, %v676_v9  ;;  %v680_v15 = vsel %vm213_vm3, %v676_v9, %v673_v3  ;;  %v665_v27 = vsel %vm196_vm1, %v663_v11, %v664_v24  ;;  %v2097_v14 = vld [vmem:[%s2679_s8 + $0x8] sm:$0xff]  }
 0x22f   :  { %1446 = vmatmul.mubr.msk.bf16.vlgmr.msra.gmra.mrb[4].mxu0 %vm1444_vm9, %v1445_v13  ;;  %v1454_v28 = vpack.c.bf16 %v680_v15, %v677_v26  ;;  %v666_v45 = vsel %vm196_vm1, %v662_v0, %v663_v11  ;;  %v2099_v26 = vld [vmem:[%s2679_s8 + $0x18] sm:$0xff]  }
 0x230   :  { %1748 = vmatprep.mubr.msk.bf16.mxu1 %vm1450_vm10, %v1451_v18  ;;  %875 = vmatprep.mubr.bf16.mxu0 %v689_v25  ;;  %v1448_v30 = vpack.c.bf16 %v665_v27, %v666_v45  ;;  %v2098_v18 = vld [vmem:[%s2679_s8 + $0x10] sm:$0xff]  }
 0x231   :  { %1749 = vmatmul.mubr.msk.bf16.vlgmr.msra.gmra.mrb[4].mxu1 %vm1453_vm11, %v1454_v28  ;;  %1954 = vmatpush3.bf16.msra.mxu0 %v2249_v29 }
 0x232   :  { %1955 = vmatprep.subr.bf16.mxu0 %v2106_v2  ;;  %1978 = vmatpush3.bf16.msra.mxu1 %v2249_v29 }
 0x233   :  { %1979 = vmatprep.subr.bf16.mxu1 %v2106_v2  ;;  %1819 = vmatprep.mubr.msk.f32.mxu1 %vm2107_vm7, %v2108_v19 }
 0x235   :  { %1957 = vmatpush3.bf16.msra.mxu0 %v2255_v31 }
 0x236   :  { %1958 = vmatprep.subr.bf16.mxu0 %v2106_v2  ;;  %1981 = vmatpush3.bf16.msra.mxu1 %v2255_v31 }
 0x237   :  { %1449 = vmatmul.mubr.msk.bf16.gmra.mrb[8].mxu0 %vm1447_vm12, %v1448_v30  ;;  %1982 = vmatprep.subr.bf16.mxu1 %v2106_v2 }
 0x238   :  { %1784 = vmatprep.mubr.msk.f32.mxu0 %vm2107_vm7, %v2108_v19 }
 0x239   :  { %1960 = vmatpush3.bf16.msra.mxu0 %v2273_v40 }
 0x23a   :  { %1961 = vmatprep.subr.bf16.mxu0 %v2106_v2  ;;  %1984 = vmatpush3.bf16.msra.mxu1 %v2273_v40 }
 0x23b   :  { %1985 = vmatprep.subr.bf16.mxu1 %v2106_v2 }
 0x23d   :  { %1963 = vmatpush3.bf16.msra.mxu0 %v2335_v5 }
 0x23e   :  { %1964 = vmatprep.subr.bf16.mxu0 %v2106_v2  ;;  %1987 = vmatpush3.bf16.msra.mxu1 %v2335_v5 }
 0x23f   :  { %1988 = vmatprep.subr.bf16.mxu1 %v2106_v2 }
 0x241   :  { %1966 = vmatpush3.bf16.msra.mxu0 %v2345_v8 }
 0x242   :  { %1967 = vmatprep.subr.bf16.mxu0 %v2106_v2  ;;  %1990 = vmatpush3.bf16.msra.mxu1 %v2345_v8 }
 0x243   :  { %1991 = vmatprep.subr.bf16.mxu1 %v2106_v2 }
 0x245   :  { %1969 = vmatpush3.bf16.msra.mxu0 %v2355_v12 }
 0x246   :  { %1970 = vmatprep.subr.bf16.mxu0 %v2106_v2  ;;  %1993 = vmatpush3.bf16.msra.mxu1 %v2355_v12 }
 0x247   :  { %1994 = vmatprep.subr.bf16.mxu1 %v2106_v2 }
 0x249   :  { %1972 = vmatpush3.bf16.msra.mxu0 %v2365_v16 }
 0x24a   :  { %1973 = vmatprep.subr.bf16.mxu0 %v2106_v2  ;;  %1996 = vmatpush3.bf16.msra.mxu1 %v2365_v16 }
 0x24b   :  { %1997 = vmatprep.subr.bf16.mxu1 %v2106_v2 }
 0x24d   :  { %1975 = vmatpush3.bf16.msra.mxu0 %v2376_v20 }
 0x24e   :  { %1999 = vmatpush3.bf16.msra.mxu1 %v2376_v20  ;;  %1822 = vmatprep.subr.bf16.mxu0 %v2096_v4 }
 0x24f   :  { %2024 = vmatprep.subr.bf16.mxu1 %v2106_v2 }
 0x302   :  { %v1530_v43 = vpop.f32.mrb[4].mxu0 }
 0x303   :  { %v1531_v60 = vpop.f32.mrb[5].mxu0 }
 0x304   :  { %v1532_v32 = vadd.f32 %v1531_v60, %v1530_v43  ;;  %v1750_v33 = vpop.f32.mrb[4].mxu1  ;;  %v1533_v34 = vpop.f32.mrb[6].mxu0 }
 0x305   :  { %v918_v35 = vpop.f32.mrb[5].mxu1  ;;  %v1534_v36 = vpop.f32.mrb[7].mxu0 }
 0x306   :  { %v2573_v37 = vadd.f32 %v1532_v32, %v918_v35  ;;  %v1535_v38 = vadd.f32 %v1534_v36, %v1533_v34  ;;  %v1751_v41 = vpop.f32.mrb[6].mxu1 }
 0x307   :  { %v921_v42 = vpop.f32.mrb[7].mxu1 }
 0x308   :  { %v2575_v44 = vadd.f32 %v1535_v38, %v921_v42  ;;  %v942_v52 = vmul.f32 %v2573_v37, %v2573_v37 }
 0x30a   :  { %v1536_v46 = vpop.f32.mrb[8].mxu0  ;;  %v943_v48 = vmul.f32 %v2575_v44, %v2575_v44  ;;  %v933_v53 = vadd.f32 %v2575_v44, %v2573_v37 }
 0x30b   :  { %v1537_v47 = vpop.f32.mrb[9].mxu0 }
 0x30c   :  { %v1538_v49 = vadd.f32 %v1537_v47, %v1536_v46  ;;  %v1539_v50 = vpop.f32.mrb[10].mxu0  ;;  %v946_v56 = vadd.f32 %v943_v48, %v942_v52 }
 0x30d   :  { %v1540_v51 = vpop.f32.mrb[11].mxu0 }
 0x30e   :  { %v2583_v54 = vadd.f32 %v1750_v33, %v1538_v49  ;;  %v1541_v55 = vadd.f32 %v1540_v51, %v1539_v50 }
 0x310   :  { %v934_v57 = vadd.f32 %v933_v53, %v2583_v54  ;;  %v944_v58 = vmul.f32 %v2583_v54, %v2583_v54  ;;  %v2588_v59 = vadd.f32 %v1751_v41, %v1541_v55 }
 0x312   :  { %v947_v61 = vadd.f32 %v946_v56, %v944_v58  ;;  %v935_v62 = vadd.f32 %v934_v57, %v2588_v59  ;;  %v945_v63 = vmul.f32 %v2588_v59, %v2588_v59 }
 0x314   :  { %v936_v0 = vrot.slane %v935_v62, 4  ;;  %v948_v1 = vadd.f32 %v947_v61, %v945_v63 }
 0x316   :  { %v937_v24 = vadd.f32 %v936_v0, %v935_v62  ;;  %v949_v3 = vrot.slane %v948_v1, 4 }
 0x318   :  { %v938_v23 = vrot.slane %v937_v24, 2  ;;  %v950_v6 = vadd.f32 %v949_v3, %v948_v1 }
 0x31a   :  { %v939_v25 = vadd.f32 %v938_v23, %v937_v24  ;;  %v951_v22 = vrot.slane %v950_v6, 2 }
 0x31c   :  { %v940_v7 = vrot.slane %v939_v25, 1  ;;  %v952_v9 = vadd.f32 %v951_v22, %v950_v6 }
 0x31e   :  { %v941_v11 = vadd.f32 %v940_v7, %v939_v25  ;;  %v953_v13 = vrot.slane %v952_v9, 1 }
 0x320   :  { %1785 = vmatmul.mubr.f32.vlgmr.msra.gmra.mrb[12].mxu0 %v941_v11  ;;  %v954_v17 = vadd.f32 %v953_v13, %v952_v9  ;;  %v1201_v9 = vld [vmem:[%s2682_s9] sm:$0x1] }
 0x321   :  { %1823 = vmatpush3.bf16.msra.mxu0 %v2096_v4  ;;  %1830 = vmatprep.mubr.msk.bf16.mxu0 %vm250_vm0, %v2196_v10 }
 0x322   :  { %1820 = vmatmul.mubr.f32.vlgmr.msra.gmra.mrb[8].mxu1 %v954_v17  ;;  %1824 = vmatprep.subr.bf16.mxu0 %v2097_v14 }
 0x323   :  { %2026 = vmatpush3.bf16.msra.mxu1 %v2249_v29  ;;  %1901 = vmatprep.mubr.msk.f32.mxu1 %vm2107_vm7, %v2108_v19 }
 0x324   :  { %2027 = vmatprep.subr.bf16.mxu1 %v2106_v2 }
 0x325   :  { %1825 = vmatpush3.bf16.msra.mxu0 %v2097_v14  ;;  %v1202_v14 = vld [vmem:[%s2683_s10] sm:$0x1] }
 0x326   :  { %1826 = vmatprep.subr.bf16.mxu0 %v2098_v18 }
 0x327   :  { %2029 = vmatpush3.bf16.msra.mxu1 %v2255_v31 }
 0x328   :  { %2030 = vmatprep.subr.bf16.mxu1 %v2106_v2 }
 0x329   :  { %1827 = vmatpush3.bf16.msra.mxu0 %v2098_v18 }
 0x32a   :  { %1828 = vmatprep.subr.bf16.mxu0 %v2099_v26 }
 0x32b   :  { %2032 = vmatpush3.bf16.msra.mxu1 %v2273_v40 }
 0x32c   :  { %2033 = vmatprep.subr.bf16.mxu1 %v2106_v2 }
 0x32d   :  { %1829 = vmatpush3.bf16.msra.mxu0 %v2099_v26 }
 0x32e   :  { %2000 = vmatprep.subr.bf16.mxu0 %v2106_v2 }
 0x32f   :  { %2035 = vmatpush3.bf16.msra.mxu1 %v2335_v5 }
 0x330   :  { %1831 = vmatmul.mubr.msk.bf16.vlgmr.msra.gmra.mrb[16].mxu0 %vm250_vm0, %v2231_v21  ;;  %2036 = vmatprep.subr.bf16.mxu1 %v2106_v2 }
 0x331   :  { %2002 = vmatpush3.bf16.msra.mxu0 %v2249_v29  ;;  %1866 = vmatprep.mubr.msk.f32.mxu0 %vm2107_vm7, %v2108_v19 }
 0x332   :  { %2003 = vmatprep.subr.bf16.mxu0 %v2106_v2 }
 0x333   :  { %2038 = vmatpush3.bf16.msra.mxu1 %v2345_v8 }
 0x334   :  { %2039 = vmatprep.subr.bf16.mxu1 %v2106_v2 }
 0x335   :  { %2005 = vmatpush3.bf16.msra.mxu0 %v2255_v31 }
 0x336   :  { %2006 = vmatprep.subr.bf16.mxu0 %v2106_v2 }
 0x337   :  { %2041 = vmatpush3.bf16.msra.mxu1 %v2355_v12 }
 0x338   :  { %2042 = vmatprep.subr.bf16.mxu1 %v2106_v2 }
 0x339   :  { %2008 = vmatpush3.bf16.msra.mxu0 %v2273_v40 }
 0x33a   :  { %2009 = vmatprep.subr.bf16.mxu0 %v2106_v2 }
 0x33b   :  { %2044 = vmatpush3.bf16.msra.mxu1 %v2365_v16 }
 0x33c   :  { %2045 = vmatprep.subr.bf16.mxu1 %v2106_v2 }
 0x33d   :  { %2011 = vmatpush3.bf16.msra.mxu0 %v2335_v5 }
 0x33e   :  { %2012 = vmatprep.subr.bf16.mxu0 %v2106_v2 }
 0x33f   :  { %2047 = vmatpush3.bf16.msra.mxu1 %v2376_v20 }
 0x341   :  { %2014 = vmatpush3.bf16.msra.mxu0 %v2345_v8  ;;  %v133_v8 = vld [vmem:[%s2680_s6] sm:$0x1] }
 0x342   :  { %2015 = vmatprep.subr.bf16.mxu0 %v2106_v2 }
 0x345   :  { %2017 = vmatpush3.bf16.msra.mxu0 %v2355_v12 }
 0x346   :  { %2018 = vmatprep.subr.bf16.mxu0 %v2106_v2 }
 0x349   :  { %2020 = vmatpush3.bf16.msra.mxu0 %v2365_v16 }
 0x34a   :  { %2021 = vmatprep.subr.bf16.mxu0 %v2106_v2  ;;  %v134_v2 = vld [vmem:[%s2681_s7] sm:$0x1] }
 0x34d   :  { %2023 = vmatpush3.bf16.msra.mxu0 %v2376_v20 }
 0x3f3   :  { %v1021_v10 = vpop.f32.mrb[12].mxu0 }
 0x3f4   :  { %v1095_v21 = vmul.f32 %v1021_v10, %v1021_v10  ;;  %v1786_v29 = vpop.f32.mrb[13].mxu0 }
 0x3f5   :  { %v1091_v31 = vpop.f32.mrb[8].mxu1 }
 0x3f6   :  { %v1096_v40 = vsub.f32 %v1091_v31, %v1095_v21  ;;  %v1821_v5 = vpop.f32.mrb[9].mxu1 }
 0x3f8   :  { %v1097_v19 = vadd.f32 1e-05, %v1096_v40 }
 0x3fa   :  { %2102 = vrsqrt.f32 %v1097_v19 }
 0x403   :  { %v1832_v12 = vpop.f32.mrb[16].mxu0 }
 0x404   :  { %v2103_v15 = vpop.eup %2102  ;;  %v1186_v27 = vpop.f32.mrb[17].mxu0  ;;  %v1214_v34 = vmul.f32 %v1832_v12, %v1832_v12 }
 0x405   :  { %v1099_v16 = vmul.f32 %v2103_v15, %v133_v8  ;;  %v1833_v28 = vpop.f32.mrb[18].mxu0  ;;  %v1212_v60 = vmul.f32 %v1186_v27, %v1186_v27 }
 0x406   :  { %v1189_v20 = vpop.f32.mrb[19].mxu0  ;;  %v1215_v47 = vmul.f32 %v1833_v28, %v1833_v28 }
 0x407   :  { %v1100_v45 = vmul.f32 %v1099_v16, %v1021_v10  ;;  %v1105_v30 = vrot.slane %v1099_v16, %v2496_v39  ;;  %v1203_v4 = vadd.f32 %v1189_v20, %v1186_v27  ;;  %v1213_v43 = vmul.f32 %v1189_v20, %v1189_v20 }
 0x409   :  { %v1101_v32 = vsub.f32 %v134_v2, %v1100_v45  ;;  %v1106_v33 = vmul.f32 %v1105_v30, %v2573_v37  ;;  %v1204_v35 = vadd.f32 %v1832_v12, %v1203_v4  ;;  %v1216_v36 = vadd.f32 %v1213_v43, %v1212_v60 }
 0x40a   :  { %v1107_v38 = vmul.f32 %v1105_v30, %v2575_v44  ;;  %v1108_v41 = vmul.f32 %v1105_v30, %v2583_v54  ;;  %v1109_v42 = vmul.f32 %v1105_v30, %v2588_v59 }
 0x40b   :  { %v1114_v46 = vrot.slane %v1101_v32, %v2496_v39  ;;  %v1205_v48 = vadd.f32 %v1833_v28, %v1204_v35  ;;  %v1217_v49 = vadd.f32 %v1216_v36, %v1214_v34 }
 0x40d   :  { %v1116_v50 = vadd.f32 %v1114_v46, %v1106_v33  ;;  %v1117_v51 = vadd.f32 %v1114_v46, %v1107_v38  ;;  %v1118_v52 = vadd.f32 %v1114_v46, %v1108_v41  ;;  %v1119_v53 = vadd.f32 %v1114_v46, %v1109_v42 }
 0x40e   :  { %v1206_v55 = vrot.slane %v1205_v48, 4  ;;  %v1218_v37 = vadd.f32 %v1217_v49, %v1215_v47 }
 0x410   :  { %v1207_v56 = vadd.f32 %v1206_v55, %v1205_v48  ;;  %v1219_v57 = vrot.slane %v1218_v37, 4 }
 0x412   :  { %v1208_v58 = vrot.slane %v1207_v56, 2  ;;  %v1220_v61 = vadd.f32 %v1219_v57, %v1218_v37 }
 0x414   :  { %v1209_v44 = vadd.f32 %v1208_v58, %v1207_v56  ;;  %v1221_v62 = vrot.slane %v1220_v61, 2 }
 0x416   :  { %v1210_v54 = vrot.slane %v1209_v44, 1  ;;  %v1222_v63 = vadd.f32 %v1221_v62, %v1220_v61 }
 0x418   :  { %v1211_v59 = vadd.f32 %v1210_v54, %v1209_v44  ;;  %v1223_v0 = vrot.slane %v1222_v63, 1 }
 0x41a   :  { %1867 = vmatmul.mubr.f32.vlgmr.msra.gmra.mrb[14].mxu0 %v1211_v59  ;;  %v1224_v1 = vadd.f32 %v1223_v0, %v1222_v63 }
 0x41c   :  { %1902 = vmatmul.mubr.f32.vlgmr.msra.gmra.mrb[10].mxu1 %v1224_v1 }
 0x4ed   :  { %v1291_v24 = vpop.f32.mrb[14].mxu0 }
 0x4ee   :  { %v1365_v3 = vmul.f32 %v1291_v24, %v1291_v24  ;;  %v1868_v23 = vpop.f32.mrb[15].mxu0 }
 0x4ef   :  { %v1361_v6 = vpop.f32.mrb[10].mxu1 }
 0x4f0   :  { %v1366_v25 = vsub.f32 %v1361_v6, %v1365_v3  ;;  %v1903_v22 = vpop.f32.mrb[11].mxu1 }
 0x4f2   :  { %v1367_v7 = vadd.f32 1e-05, %v1366_v25 }
 0x4f4   :  { %2104 = vrsqrt.f32 %v1367_v7 }
 0x4fe   :  { %v2105_v11 = vpop.eup %2104 }
 0x4ff   :  { %v1369_v13 = vmul.f32 %v2105_v11, %v1201_v9 }
 0x501   :  { %v1370_v17 = vmul.f32 %v1369_v13, %v1291_v24  ;;  %v1375_v18 = vrot.slane %v1369_v13, %v2496_v39 }
 0x503   :  { %v1371_v26 = vsub.f32 %v1202_v14, %v1370_v17  ;;  %v1376_v10 = vmul.f32 %v1375_v18, %v1186_v27  ;;  %v1377_v21 = vmul.f32 %v1375_v18, %v1189_v20  ;;  %v1378_v29 = vmul.f32 %v1832_v12, %v1375_v18 }
 0x504   :  { %v1379_v31 = vmul.f32 %v1833_v28, %v1375_v18 }
 0x505   :  { %v1384_v40 = vrot.slane %v1371_v26, %v2496_v39 }
 0x507   :  { %v1386_v5 = vadd.f32 %v1384_v40, %v1376_v10  ;;  %v1387_v19 = vadd.f32 %v1384_v40, %v1377_v21  ;;  %v1388_v8 = vadd.f32 %v1384_v40, %v1378_v29  ;;  %v1389_v15 = vadd.f32 %v1384_v40, %v1379_v31 }
 0x509   :  { %v1390_v16 = vadd.f32 %v1386_v5, %v1116_v50  ;;  %v1391_v2 = vadd.f32 %v1387_v19, %v1117_v51  ;;  %v1392_v45 = vadd.f32 %v1388_v8, %v1118_v52  ;;  %v1393_v30 = vadd.f32 %v1389_v15, %v1119_v53 }
 0x50b   :  { %1394 = vst [vmem:[%s2684_s11] sm:$0xff] %v1390_v16  ;;  %1395 = vst [vmem:[%s2684_s11 + $0x8] sm:$0xff] %v1391_v2 }
 0x50c   :  { %1396 = vst [vmem:[%s2684_s11 + $0x10] sm:$0xff] %v1392_v45  ;;  %1397 = vst [vmem:[%s2684_s11 + $0x18] sm:$0xff] %v1393_v30 }

</bundles_post_ra>
